<compile_context>
chip_gen: v6e
topology: v6e:2x2x1
jax: 0.10.0
libtpu: 0.0.40
codegen_flags: <defaults>
</compile_context>

<pallas_src>
import jax
import jax.numpy as jnp
from jax import lax
from jax.experimental import pallas as pl
from jax.experimental.pallas import tpu as pltpu


def _round_up(x, m):
    return ((x + m - 1) // m) * m


# ---------------------------------------------------------------------------
# Kernel 1: per-point MLP (K -> 64 -> 128 -> 1024) + max-pool over points.
# Grid: (point-split, batch tile, point tile).  acc_ref holds the f32 running
# max of the raw layer-3 matmul; bias-3 + ReLU applied once at the last step.
# ---------------------------------------------------------------------------
_CW = 256  # layer-3 output column chunk width


def point_mlp_max_kernel(x_ref, w1_ref, b1_ref, w2_ref, b2_ref,
                         w3_ref, b3_ref, o_ref, acc_ref):
    n = pl.program_id(2)

    @pl.when(n == 0)
    def _():
        acc_ref[...] = jnp.full(acc_ref.shape, -jnp.inf, dtype=acc_ref.dtype)

    bt, tn, kdim = x_ref.shape
    rows = bt * tn
    x = x_ref[...].reshape(rows, kdim)                           # bf16 (rows, K)

    h = jnp.dot(x, w1_ref[...], preferred_element_type=jnp.float32)
    h = jnp.maximum(h + b1_ref[...], 0.0)                        # (rows, 64)  f32
    h = jnp.dot(h.astype(jnp.bfloat16), w2_ref[...],
                preferred_element_type=jnp.float32)
    h = jnp.maximum(h + b2_ref[...], 0.0).astype(jnp.bfloat16)   # (rows, 128) bf16

    n_chunks = w3_ref.shape[1] // _CW

    def chunk_body(c, carry):
        off = pl.multiple_of(c * _CW, _CW)
        h3 = jnp.dot(h, w3_ref[:, pl.ds(off, _CW)],
                     preferred_element_type=jnp.float32)         # (rows, CW) f32
        cmax = jnp.max(h3.reshape(bt, tn, _CW), axis=1)          # (bt, CW)
        acc_ref[:, pl.ds(off, _CW)] = jnp.maximum(
            acc_ref[:, pl.ds(off, _CW)], cmax)
        return carry

    lax.fori_loop(0, n_chunks, chunk_body, 0)

    @pl.when(n == pl.num_programs(2) - 1)
    def _():
        # Deferred layer-3 bias + ReLU, applied once per output block.
        o_ref[...] = jnp.maximum(acc_ref[...] + b3_ref[...],
                                 0.0).astype(o_ref.dtype)


def point_mlp_max(x_bnk, w1, b1, w2, b2, w3, b3, *, bt, tn, ns, nt):
    B_pad, N_pad, K_pad = x_bnk.shape
    assert N_pad == ns * tn * nt and B_pad % bt == 0
    const = lambda arr: pl.BlockSpec(arr.shape, lambda s, b, n: (0, 0))
    return pl.pallas_call(
        point_mlp_max_kernel,
        out_shape=jax.ShapeDtypeStruct((ns, B_pad, 1024), jnp.bfloat16),
        grid=(ns, B_pad // bt, nt),
        in_specs=[
            pl.BlockSpec((bt, tn, K_pad), lambda s, b, n: (b, s * nt + n, 0)),
            const(w1), const(b1), const(w2), const(b2), const(w3), const(b3),
        ],
        out_specs=pl.BlockSpec((None, bt, 1024), lambda s, b, n: (s, b, 0)),
        scratch_shapes=[pltpu.VMEM((bt, 1024), jnp.float32)],
        compiler_params=pltpu.CompilerParams(
            dimension_semantics=("parallel", "parallel", "arbitrary"),
            vmem_limit_bytes=48 << 20,   # safe on v7x's 64 MiB VMEM
        ),
    )(x_bnk, w1, b1, w2, b2, w3, b3)


# ---------------------------------------------------------------------------
# Kernel 2: FC head 1024 -> 512 -> 256 -> k*k, single step, weights whole.
# ---------------------------------------------------------------------------
def fc_head_kernel(g_ref, w4_ref, b4_ref, w5_ref, b5_ref,
                   w6_ref, b6i_ref, o_ref):
    h = jnp.dot(g_ref[...], w4_ref[...], preferred_element_type=jnp.float32)
    h = jnp.maximum(h + b4_ref[...], 0.0)                        # (B, 512)
    h = jnp.dot(h.astype(jnp.bfloat16), w5_ref[...],
                preferred_element_type=jnp.float32)
    h = jnp.maximum(h + b5_ref[...], 0.0)                        # (B, 256)
    out = jnp.dot(h.astype(jnp.bfloat16), w6_ref[...],
                  preferred_element_type=jnp.float32)            # (B, k*k)
    o_ref[...] = out + b6i_ref[...]                              # bias + identity


def fc_head(g, w4, b4, w5, b5, w6, b6_iden):
    B_pad = g.shape[0]
    kk = w6.shape[1]
    const = lambda arr: pl.BlockSpec(arr.shape, lambda i: (0, 0))
    return pl.pallas_call(
        fc_head_kernel,
        out_shape=jax.ShapeDtypeStruct((B_pad, kk), jnp.float32),
        grid=(1,),
        in_specs=[const(g), const(w4), const(b4), const(w5), const(b5),
                  const(w6), const(b6_iden)],
        out_specs=pl.BlockSpec((B_pad, kk), lambda i: (0, 0)),
        compiler_params=pltpu.CompilerParams(
            dimension_semantics=("arbitrary",),
            vmem_limit_bytes=32 << 20,
        ),
    )(g, w4, b4, w5, b5, w6, b6_iden)


# ---------------------------------------------------------------------------
# Parameter construction (deterministic, synthetic) + BN folding
# ---------------------------------------------------------------------------
def make_params(key, k):
    """Weights stored as (in, out) so x @ W matches PyTorch's x @ W.T."""
    dims = [(k, 64), (64, 128), (128, 1024), (1024, 512), (512, 256),
            (256, k * k)]
    params = {}
    for i, (cin, cout) in enumerate(dims, start=1):
        key, kw, kb = jax.random.split(key, 3)
        params[f"w{i}"] = jax.random.normal(kw, (cin, cout), jnp.float32) * 0.05
        params[f"b{i}"] = jax.random.normal(kb, (cout,), jnp.float32) * 0.05
    bn_dims = [64, 128, 1024, 512, 256]
    for i, c in enumerate(bn_dims, start=1):
        key, kg, kb, km, kv = jax.random.split(key, 5)
        params[f"bn{i}_gamma"] = 1.0 + 0.1 * jax.random.normal(kg, (c,), jnp.float32)
        params[f"bn{i}_beta"] = 0.1 * jax.random.normal(kb, (c,), jnp.float32)
        params[f"bn{i}_mean"] = 0.1 * jax.random.normal(km, (c,), jnp.float32)
        params[f"bn{i}_var"] = 1.0 + 0.1 * jax.random.uniform(kv, (c,), jnp.float32)
    return params


def fold_bn(w, b, gamma, beta, mean, var, eps=1e-5):
    """Fold eval-mode BatchNorm into a preceding (x @ w + b) layer."""
    scale = gamma / jnp.sqrt(var + eps)
    w_f = w * scale[None, :]
    b_f = (b - mean) * scale + beta
    return w_f, b_f.reshape(1, -1)


# TODO(synk): BatchNorm is implemented in inference mode (running stats);
# PyTorch's default training-mode batch statistics are not reproduced.
def stnkd_forward(x_bkn, params, k):
    """x_bkn: (B, k, N) float32, matching PyTorch Conv1d input layout."""
    B, _, N = x_bkn.shape

    w1, b1 = fold_bn(params["w1"], params["b1"], params["bn1_gamma"],
                     params["bn1_beta"], params["bn1_mean"], params["bn1_var"])
    w2, b2 = fold_bn(params["w2"], params["b2"], params["bn2_gamma"],
                     params["bn2_beta"], params["bn2_mean"], params["bn2_var"])
    w3, b3 = fold_bn(params["w3"], params["b3"], params["bn3_gamma"],
                     params["bn3_beta"], params["bn3_mean"], params["bn3_var"])
    w4, b4 = fold_bn(params["w4"], params["b4"], params["bn4_gamma"],
                     params["bn4_beta"], params["bn4_mean"], params["bn4_var"])
    w5, b5 = fold_bn(params["w5"], params["b5"], params["bn5_gamma"],
                     params["bn5_beta"], params["bn5_mean"], params["bn5_var"])
    w6 = params["w6"]
    # Pre-add bias6 + flattened identity (saves one kernel input / DMA / add).
    b6_iden = (params["b6"].reshape(1, -1)
               + jnp.eye(k, dtype=jnp.float32).reshape(1, k * k))

    # Lane-dense layer-1: pad the channel dim; padded w1 rows are zero so the
    # (edge-replicated) extra x channels contribute nothing to the matmul.
    K_pad = _round_up(k, 128) if k >= 64 else _round_up(k, 8)
    if K_pad > k:
        w1 = jnp.pad(w1, ((0, K_pad - k), (0, 0)))

    # bf16 weights for the MXU (accumulation stays f32).
    bf = lambda w: w.astype(jnp.bfloat16)
    w1, w2, w3, w4, w5, w6 = bf(w1), bf(w2), bf(w3), bf(w4), bf(w5), bf(w6)

    # ---- tiling -----------------------------------------------------------
    if B >= 8:
        BT, B_pad = 8, _round_up(B, 8)
    else:
        BT, B_pad = B, B                 # small batch: skip batch padding
    NB = B_pad // BT
    # If the (parallel) batch grid has a single step, split the point axis into
    # two parallel partial maxes so both v7x TensorCores get work (cheap extra
    # max in the wrapper; on single-TC chips it is just a loop split).
    NS = 2 if (NB == 1 and N >= 16) else 1
    TN = min(1024, _round_up(-(-N // NS), 8))
    NT = -(-N // (NS * TN))
    N_pad = NS * TN * NT

    # bf16 cast BEFORE the transpose (halves transpose HBM bytes); one fused
    # edge pad over batch / point / channel dims (all max-invariant / masked).
    # TODO(synk): accept the native (B, K, N) layout in kernel 1 (contract over
    # K with dot_general) to drop this host-side transpose entirely.
    x = jnp.transpose(x_bkn.astype(jnp.bfloat16), (0, 2, 1))      # (B, N, k)
    x = jnp.pad(x, ((0, B_pad - B), (0, N_pad - N), (0, K_pad - k)),
                mode="edge")

    g_parts = point_mlp_max(x, w1, b1, w2, b2, w3, b3,
                            bt=BT, tn=TN, ns=NS, nt=NT)  # (NS, B_pad, 1024) bf16
    g = g_parts[0] if NS == 1 else jnp.max(g_parts, axis=0)       # (B_pad, 1024)

    out = fc_head(g, w4, b4, w5, b5, w6, b6_iden)                 # (B_pad, k*k)
    return out[:B].reshape(B, k, k)


def stnkd_reference(x_bkn, params, k):
    """Pure-JAX f32 reference for correctness checking."""
    eps = 1e-5
    x = jnp.transpose(x_bkn, (0, 2, 1))  # (B, N, k)

    def conv_bn_relu(h, i):
        h = h @ params[f"w{i}"] + params[f"b{i}"]
        scale = params[f"bn{i}_gamma"] / jnp.sqrt(params[f"bn{i}_var"] + eps)
        h = (h - params[f"bn{i}_mean"]) * scale + params[f"bn{i}_beta"]
        return jnp.maximum(h, 0.0)

    h = conv_bn_relu(x, 1)
    h = conv_bn_relu(h, 2)
    h = conv_bn_relu(h, 3)
    g = jnp.max(h, axis=1)                 # (B, 1024)
    g = conv_bn_relu(g, 4)
    g = conv_bn_relu(g, 5)
    out = g @ params["w6"] + params["b6"]
    out = out + jnp.eye(k, dtype=jnp.float32).reshape(1, k * k)
    return out.reshape(-1, k, k)


if __name__ == "__main__":
    K = 64         # module default k=64
    B, N = 2, 128  # small batch, small number of points

    key = jax.random.PRNGKey(0)
    key, kx = jax.random.split(key)
    x = jax.random.normal(kx, (B, K, N), jnp.float32)   # PyTorch layout (B, C, N)
    params = make_params(key, K)

    out = stnkd_forward(x, params, K)
    out = jax.block_until_ready(out)

    ref = stnkd_reference(x, params, K)
    assert out.shape == (B, K, K)
    max_err = float(jnp.max(jnp.abs(out - ref)))
    # bf16 matmul inputs (f32 accumulation) -> loosened tolerance vs f32 ref.
    assert jnp.allclose(out, ref, atol=2e-2, rtol=2e-2), \
        f"mismatch vs reference (max abs err {max_err})"

    print("KERNEL_OK")
</pallas_src>

<mosaic_0001>
module attributes {stable_mosaic.version = 11 : i64} {
  func.func @point_mlp_max_kernel(%arg0: i32, %arg1: i32, %arg2: i32, %arg3: memref<2x64x128xbf16, #tpu.memory_space<vmem>>, %arg4: memref<128x64xbf16, #tpu.memory_space<vmem>>, %arg5: memref<1x64xf32, #tpu.memory_space<vmem>>, %arg6: memref<64x128xbf16, #tpu.memory_space<vmem>>, %arg7: memref<1x128xf32, #tpu.memory_space<vmem>>, %arg8: memref<128x1024xbf16, #tpu.memory_space<vmem>>, %arg9: memref<1x1024xf32, #tpu.memory_space<vmem>>, %arg10: memref<1x2x1024xbf16, #tpu.memory_space<vmem>>, %arg11: memref<2x1024xf32, #tpu.memory_space<vmem>>) attributes {dimension_semantics = [#tpu.dimension_semantics<parallel>, #tpu.dimension_semantics<parallel>, #tpu.dimension_semantics<arbitrary>], iteration_bounds = array<i64: 2, 1, 1>, scalar_prefetch = 0 : i64, scratch_operands = 1 : i64, tpu.core_type = #tpu.core_type<tc>, window_params = [{transform_indices = @transform_0, window_bounds = array<i64: 2, 64, 128>}, {pipeline_mode = #tpu.pipeline_mode<synchronous>, transform_indices = @transform_1, window_bounds = array<i64: 128, 64>}, {pipeline_mode = #tpu.pipeline_mode<synchronous>, transform_indices = @transform_2, window_bounds = array<i64: 1, 64>}, {pipeline_mode = #tpu.pipeline_mode<synchronous>, transform_indices = @transform_3, window_bounds = array<i64: 64, 128>}, {pipeline_mode = #tpu.pipeline_mode<synchronous>, transform_indices = @transform_4, window_bounds = array<i64: 1, 128>}, {pipeline_mode = #tpu.pipeline_mode<synchronous>, transform_indices = @transform_5, window_bounds = array<i64: 128, 1024>}, {pipeline_mode = #tpu.pipeline_mode<synchronous>, transform_indices = @transform_6, window_bounds = array<i64: 1, 1024>}, {transform_indices = @transform_7, window_bounds = array<i64: 1, 2, 1024>}]} {
    %c0_i32 = arith.constant 0 : i32
    %0 = arith.cmpi eq, %arg2, %c0_i32 : i32
    %1 = arith.extui %0 : i1 to i32
    %c0_i32_0 = arith.constant 0 : i32
    %2 = arith.cmpi ne, %1, %c0_i32_0 : i32
    scf.if %2 {
      %cst_18 = arith.constant 0xFF800000 : f32
      %25 = vector.broadcast %cst_18 : f32 to vector<2x1024xf32>
      %c0_19 = arith.constant 0 : index
      %c0_20 = arith.constant 0 : index
      %26 = vector.load %arg11[%c0_19, %c0_20] : memref<2x1024xf32, #tpu.memory_space<vmem>>, vector<2x1024xf32>
      tpu.vector_store %arg11[%c0_19, %c0_20], %25 {strides = array<i32>} : memref<2x1024xf32, #tpu.memory_space<vmem>>, vector<2x1024xf32>,
    } else {
    }
    %c0 = arith.constant 0 : index
    %c0_1 = arith.constant 0 : index
    %c0_2 = arith.constant 0 : index
    %3 = vector.load %arg3[%c0, %c0_1, %c0_2] : memref<2x64x128xbf16, #tpu.memory_space<vmem>>, vector<2x64x128xbf16>
    %4 = vector.shape_cast %3 : vector<2x64x128xbf16> to vector<128x128xbf16>
    %c0_3 = arith.constant 0 : index
    %c0_4 = arith.constant 0 : index
    %5 = vector.load %arg4[%c0_3, %c0_4] : memref<128x64xbf16, #tpu.memory_space<vmem>>, vector<128x64xbf16>
    %cst = arith.constant dense<0.000000e+00> : vector<128x64xf32>
    %6 = tpu.matmul %4, %5, %cst {dimension_numbers = #tpu.dot_dimension_numbers<[1], [0], [0], [1], [0, 0, 1, 1], [], []>} : vector<128x128xbf16>, vector<128x64xbf16>, vector<128x64xf32> -> vector<128x64xf32>
    %c0_5 = arith.constant 0 : index
    %c0_6 = arith.constant 0 : index
    %7 = vector.load %arg5[%c0_5, %c0_6] : memref<1x64xf32, #tpu.memory_space<vmem>>, vector<1x64xf32>
    %8 = vector.broadcast %7 : vector<1x64xf32> to vector<128x64xf32>
    %9 = arith.addf %6, %8 : vector<128x64xf32>
    %cst_7 = arith.constant 0.000000e+00 : f32
    %10 = vector.broadcast %cst_7 : f32 to vector<128x64xf32>
    %11 = arith.maximumf %9, %10 : vector<128x64xf32>
    %12 = arith.truncf %11 : vector<128x64xf32> to vector<128x64xbf16>
    %c0_8 = arith.constant 0 : index
    %c0_9 = arith.constant 0 : index
    %13 = vector.load %arg6[%c0_8, %c0_9] : memref<64x128xbf16, #tpu.memory_space<vmem>>, vector<64x128xbf16>
    %cst_10 = arith.constant dense<0.000000e+00> : vector<128x128xf32>
    %14 = tpu.matmul %12, %13, %cst_10 {dimension_numbers = #tpu.dot_dimension_numbers<[1], [0], [0], [1], [0, 0, 1, 1], [], []>} : vector<128x64xbf16>, vector<64x128xbf16>, vector<128x128xf32> -> vector<128x128xf32>
    %c0_11 = arith.constant 0 : index
    %c0_12 = arith.constant 0 : index
    %15 = vector.load %arg7[%c0_11, %c0_12] : memref<1x128xf32, #tpu.memory_space<vmem>>, vector<1x128xf32>
    %16 = vector.broadcast %15 : vector<1x128xf32> to vector<128x128xf32>
    %17 = arith.addf %14, %16 : vector<128x128xf32>
    %cst_13 = arith.constant 0.000000e+00 : f32
    %18 = vector.broadcast %cst_13 : f32 to vector<128x128xf32>
    %19 = arith.maximumf %17, %18 : vector<128x128xf32>
    %20 = arith.truncf %19 : vector<128x128xf32> to vector<128x128xbf16>
    %c0_i32_14 = arith.constant 0 : i32
    %c4_i32 = arith.constant 4 : i32
    %21 = arith.addi %c0_i32_14, %c4_i32 : i32
    %c1_i32 = arith.constant 1 : i32
    scf.for %arg12 = %c0_i32_14 to %21 step %c1_i32  : i32 {
      %c256_i32 = arith.constant 256 : i32
      %25 = arith.muli %arg12, %c256_i32 : i32
      %26 = tpu.assume_multiple %25, 256 : i32
      %c0_18 = arith.constant 0 : index
      %27 = arith.index_cast %26 : i32 to index
      %28 = vector.load %arg8[%c0_18, %27] : memref<128x1024xbf16, #tpu.memory_space<vmem>>, vector<128x256xbf16>
      %cst_19 = arith.constant dense<0.000000e+00> : vector<128x256xf32>
      %29 = tpu.matmul %20, %28, %cst_19 {dimension_numbers = #tpu.dot_dimension_numbers<[1], [0], [0], [1], [0, 0, 1, 1], [], []>} : vector<128x128xbf16>, vector<128x256xbf16>, vector<128x256xf32> -> vector<128x256xf32>
      %30 = vector.shape_cast %29 : vector<128x256xf32> to vector<2x64x256xf32>
      %cst_20 = arith.constant dense<0xFF800000> : vector<2x256xf32>
      %31 = vector.multi_reduction <maximumf>, %30, %cst_20 [1] : vector<2x64x256xf32> to vector<2x256xf32>
      %c0_21 = arith.constant 0 : index
      %32 = arith.index_cast %26 : i32 to index
      %33 = vector.load %arg11[%c0_21, %32] : memref<2x1024xf32, #tpu.memory_space<vmem>>, vector<2x256xf32>
      %34 = arith.maximumf %33, %31 : vector<2x256xf32>
      %c0_22 = arith.constant 0 : index
      %35 = arith.index_cast %26 : i32 to index
      %36 = vector.load %arg11[%c0_22, %35] : memref<2x1024xf32, #tpu.memory_space<vmem>>, vector<2x256xf32>
      tpu.vector_store %arg11[%c0_22, %35], %34 {strides = array<i32>} : memref<2x1024xf32, #tpu.memory_space<vmem>>, vector<2x256xf32>,
    }
    %c4_i32_15 = arith.constant 4 : i32
    %c0_i32_16 = arith.constant 0 : i32
    %22 = arith.cmpi eq, %arg2, %c0_i32_16 : i32
    %23 = arith.extui %22 : i1 to i32
    %c0_i32_17 = arith.constant 0 : i32
    %24 = arith.cmpi ne, %23, %c0_i32_17 : i32
    scf.if %24 {
      %c0_18 = arith.constant 0 : index
      %c0_19 = arith.constant 0 : index
      %25 = vector.load %arg11[%c0_18, %c0_19] : memref<2x1024xf32, #tpu.memory_space<vmem>>, vector<2x1024xf32>
      %c0_20 = arith.constant 0 : index
      %c0_21 = arith.constant 0 : index
      %26 = vector.load %arg9[%c0_20, %c0_21] : memref<1x1024xf32, #tpu.memory_space<vmem>>, vector<1x1024xf32>
      %27 = vector.broadcast %26 : vector<1x1024xf32> to vector<2x1024xf32>
      %28 = arith.addf %25, %27 : vector<2x1024xf32>
      %cst_22 = arith.constant 0.000000e+00 : f32
      %29 = vector.broadcast %cst_22 : f32 to vector<2x1024xf32>
      %30 = arith.maximumf %28, %29 : vector<2x1024xf32>
      %31 = arith.truncf %30 : vector<2x1024xf32> to vector<2x1024xbf16>
      %c0_23 = arith.constant 0 : index
      %c0_24 = arith.constant 0 : index
      %c0_25 = arith.constant 0 : index
      %32 = vector.load %arg10[%c0_23, %c0_24, %c0_25] : memref<1x2x1024xbf16, #tpu.memory_space<vmem>>, vector<1x2x1024xbf16>
      %33 = vector.shape_cast %32 : vector<1x2x1024xbf16> to vector<2x1024xbf16>
      %34 = vector.shape_cast %31 : vector<2x1024xbf16> to vector<1x2x1024xbf16>
      tpu.vector_store %arg10[%c0_23, %c0_24, %c0_25], %34 {strides = array<i32>} : memref<1x2x1024xbf16, #tpu.memory_space<vmem>>, vector<1x2x1024xbf16>,
    } else {
    }
    return
  }
  func.func @transform_0(%arg0: i32, %arg1: i32, %arg2: i32) -> (i32, i32, i32) {
    %c1_i32 = arith.constant 1 : i32
    %0 = arith.muli %arg0, %c1_i32 : i32
    %1 = arith.addi %0, %arg2 : i32
    %c0_i32 = arith.constant 0 : i32
    %c0_i32_0 = arith.constant 0 : i32
    return %arg1, %1, %c0_i32 : i32, i32, i32
  }
  func.func @transform_1(%arg0: i32, %arg1: i32, %arg2: i32) -> (i32, i32) {
    %c0_i32 = arith.constant 0 : i32
    %c0_i32_0 = arith.constant 0 : i32
    %c0_i32_1 = arith.constant 0 : i32
    return %c0_i32, %c0_i32_0 : i32, i32
  }
  func.func @transform_2(%arg0: i32, %arg1: i32, %arg2: i32) -> (i32, i32) {
    %c0_i32 = arith.constant 0 : i32
    %c0_i32_0 = arith.constant 0 : i32
    %c0_i32_1 = arith.constant 0 : i32
    return %c0_i32, %c0_i32_0 : i32, i32
  }
  func.func @transform_3(%arg0: i32, %arg1: i32, %arg2: i32) -> (i32, i32) {
    %c0_i32 = arith.constant 0 : i32
    %c0_i32_0 = arith.constant 0 : i32
    %c0_i32_1 = arith.constant 0 : i32
    return %c0_i32, %c0_i32_0 : i32, i32
  }
  func.func @transform_4(%arg0: i32, %arg1: i32, %arg2: i32) -> (i32, i32) {
    %c0_i32 = arith.constant 0 : i32
    %c0_i32_0 = arith.constant 0 : i32
    %c0_i32_1 = arith.constant 0 : i32
    return %c0_i32, %c0_i32_0 : i32, i32
  }
  func.func @transform_5(%arg0: i32, %arg1: i32, %arg2: i32) -> (i32, i32) {
    %c0_i32 = arith.constant 0 : i32
    %c0_i32_0 = arith.constant 0 : i32
    %c0_i32_1 = arith.constant 0 : i32
    return %c0_i32, %c0_i32_0 : i32, i32
  }
  func.func @transform_6(%arg0: i32, %arg1: i32, %arg2: i32) -> (i32, i32) {
    %c0_i32 = arith.constant 0 : i32
    %c0_i32_0 = arith.constant 0 : i32
    %c0_i32_1 = arith.constant 0 : i32
    return %c0_i32, %c0_i32_0 : i32, i32
  }
  func.func @transform_7(%arg0: i32, %arg1: i32, %arg2: i32) -> (i32, i32, i32) {
    %c0_i32 = arith.constant 0 : i32
    %c0_i32_0 = arith.constant 0 : i32
    return %arg0, %arg1, %c0_i32 : i32, i32, i32
  }
}

</mosaic_0001>

<bundles_post_ra>
// kernel: tpu_custom_call.1
= control target key start
LH: loop header
LB: loop body
LE: loop exit
PB: predicated region body
PF: predicated region fallthrough
CT: control target
= control target key end

     0   :  { %s2222_s0 = inlined_call_operand.hbm [shape: bf16[2,128,128], index: 0, kind: input, shape index: {}]   ;;  %s2223_s1 = inlined_call_operand.vmem [shape: bf16[128,64], index: 1, kind: input, shape index: {}]   ;;  %s2224_s2 = inlined_call_operand.vmem [shape: f32[1,64], index: 2, kind: input, shape index: {}]   ;;  %s2225_s3 = inlined_call_operand.vmem [shape: bf16[64,128], index: 3, kind: input, shape index: {}]   ;;  %s2226_s4 = inlined_call_operand.vmem [shape: f32[1,128], index: 4, kind: input, shape index: {}]   ;;  %s2227_s5 = inlined_call_operand.hbm [shape: bf16[128,1024], index: 5, kind: input, shape index: {}]   ;;  %s2228_s6 = inlined_call_operand.vmem [shape: f32[1,1024], index: 6, kind: input, shape index: {}]   ;;  %s2229_s7 = inlined_call_operand.hbm [shape: bf16[2,2,1024], index: 7, kind: output, shape index: {}]  }
   0x1   :  { %2235 = sst [smem:[#allocation19_spill]] %s2227_s5 }
   0x2   :  { %12 = vsyncpa [#allocation4], 0 }
   0x3   :  { %14 = vsyncpa [#allocation4 + $0x1], 0 }
   0x4   :  { %15 = vsyncpa [#allocation7], 0 }
   0x5   :  { %16 = vsyncpa [#allocation5], 0 }
   0x6   :  { %18 = vsyncpa [#allocation5 + $0x1], 0  ;;  %s1905_s24 = smov 0   ;;  %s1907_s25 = smov 0  }
   0x7   :  { %s1909_s26 = smov 0   ;;  %s1911_s27 = smov 0  }
   0x8   :  { %s1913_s28 = smov 0   ;;  %s1915_s29 = smov 0  }
   0x9 LB: > { %2236 = sst [smem:[#allocation15_spill]] %s1833_s26  ;;  %s1442_s30 = sadd.s32 4294967295, %s1845_s29   ;;  %s1845_s29 = sphi %s1915_s29, %s24_s29   ;;  %s1841_s28 = sphi %s1913_s28, %s2253_s28   ;;  %s1837_s27 = sphi %s1911_s27, %s2252_s27   ;;  %s1833_s26 = sphi %s1909_s26, %s2251_s26   ;;  %s1829_s25 = sphi %s1907_s25, %s2255_s25   ;;  %s1825_s24 = sphi %s1905_s24, %s2254_s24  }
   0xa   : > { %2237 = sst [smem:[#allocation16_spill]] %s1841_s28  ;;  %s1443_s8 = sadd.s32 4294967294, %s1845_s29  }
   0xb   : > { %s43_s9 = sadd.s32 1, %s1841_s28  ;;  %s54_s10 = sadd.s32 1, %s1833_s26 }
   0xc   : > { %p45_p0 = scmp.ge.s32.totalorder %s43_s9, 2  ;;  %p61_p1 = scmp.ne.s32.totalorder %s1833_s26, %s1829_s25 }
   0xd   : > { %p62_p2 = scmp.eq.s32.totalorder %s1845_s29, 0  ;;  %p67_p3 = scmp.ne.s32.totalorder %s1829_s25, %s1825_s24 }
   0xe   : > { %s2257_s9 = smov (%p45_p0, %s43_s9), 0  ;;  %p1950_p5 = scmp.eq.s32.totalorder %s1442_s30, 0 }
   0xf   : > { %2238 = sst [smem:[#allocation17_spill]] %s2257_s9  ;;  %p1946_p4 = por %p62_p2, %p61_p1 }
  0x10   : > { %s50_s13 = ssub.s32 %s1841_s28, %s2257_s9  ;;  %p219_p6 = scmp.eq.s32.totalorder %s1442_s30, 1 }
  0x11   : > { %p52_p7 = scmp.eq.s32.totalorder %s50_s13, 0  ;;  %p1958_p8 = por %p1950_p5, %p67_p3 }
  0x12   : > { %p1962_p9 = por %p219_p6, %p61_p1  ;;  %p225_p10 = scmp.eq.s32.totalorder %s1443_s8, 1 }
  0x13   : > { %s2241_s14 = scalar_select %p1958_p8, 1, 0 }
  0x14   : > { %s2242_s15 = scalar_select %p1962_p9, 1, 0 }
  0x15   : > { %s1967_s16 = scalar_select %p52_p7, %s1833_s26, %s54_s10  }
  0x16   : > { %p1969_p11 = por %p225_p10, %p67_p3  ;;  %p1444_p12 = scmp.ge.s32.totalorder %s1845_s29, 1 }
  0x17   : > { %2243 = sst [smem:[#allocation18_spill]] %s1967_s16  ;;  %p232_p13 = scmp.lt.s32.totalorder %s1845_s29, 3 }
  0x18   : > { %s2244_s17 = scalar_select %p1969_p11, 1, 0 }
  0x19   : > { %p1975_p0 = pnand %p1444_p12, %p232_p13  ;;  %s1851_s19 = smov [#allocation6]  }
  0x1a   : > { %s256_s20 = sshll.u32 %s1851_s19, 4  ;;  %s257_s20 = int_to_ptr.vmem [resolvable:$true] %s256_s20 }
  0x1b   : > { %p1631_p1 = pneg %p1975_p0  ;;  %s1742_s21 = scalar_lea.vmem %s257_s20, 8192 }
  0x1c   : > { %p1743_p3 = scmp.ne.s32.totalorder %s257_s20, %s1742_s21  ;;  %p1750_p11 = scmp.lt.s32.totalorder %s257_s20, %s257_s20 }
  0x1d   : > { %p1632_p2 = pnand %p1631_p1, %p1950_p5  ;;  %p1751_p9 = scmp.lt.s32.totalorder %s1742_s21, %s1742_s21 }
  0x1f   : > { %p1733_p6 = pneg %p1632_p2  ;;  %p1752_p8 = por %p1751_p9, %p1750_p11 }
  0x21   : > { %p1745_p7 = pnand %p1743_p3, %p1733_p6 }
  0x23   : > { %p1746_p10 = pneg %p1745_p7 }
  0x25   : > { %p1753_p12 = pnand %p1752_p8, %p1746_p10 }
  0x27   : > { %1756 = shalt.err (!%p1753_p12)
}
  0x28   : > { %s1852_s22 = smov 512   ;;  %s1853_s23 = smov 32  }
  0x29   : > { %s2246_s5 = sld [smem:[#allocation19_spill]]  ;;  %p1446_p13 = scmp.ge.s32.totalorder %s1845_s29, 2 }
  0x2b   : > { %269 = sbr.rel (%p1446_p13) target bundleno = 61 (0x3d), region = 40 }
  0x2f   : > { %1634 = dma.hbm_to_vmem [thread:$0]  (!%p1632_p2), %s2246_s5, 8192, %s257_s20, [#allocation7], %s1852_s22, %s1852_s22, %s1853_s23  }
  0x30   : > { %s273_s10 = sand.u32 1, %s1833_s26   ;;  %s1514_s13 = sshll.u32 %s1841_s28, 9 }
  0x31   : > { %s1447_s19 = sshll.u32 %s273_s10, 6  ;;  %s287_s20 = scalar_lea.hbm %s2222_s0, %s1514_s13 }
  0x32   : > { %s1618_s22 = scalar_select %p1946_p4, [#allocation0], [#allocation11] }
  0x33   : > { %s277_s23 = scalar_lea.vmem [#allocation3], %s1447_s19  ;;  %s1854_s5 = smov 1024  }
  0x34   : > { %s300_s30 = sshll.u32 %s277_s23, 4  ;;  %s292_s8 = sld [smem:[%s1618_s22]]   ;;  %s301_s30 = int_to_ptr.vmem [resolvable:$true] %s300_s30 }
  0x35   : > { %1619 = sst [smem:[#allocation10]] (%p1946_p4), %s1854_s5  ;;  %s1855_s16 = smov 512  }
  0x36   : > { %1620 = sst [smem:[#allocation10 + $0x1]] (%p1946_p4), %s1855_s16  ;;  %s1856_s28 = smov 8  }
  0x37   : > { %1621 = sst [smem:[#allocation10 + $0x2]] (%p1946_p4), %s1856_s28  ;;  %s1857_s26 = smov 64  }
  0x38   : > { %1622 = sst [smem:[#allocation10 + $0x3]] (%p1946_p4), %s1857_s26  ;;  %s1858_s13 = smov 4  }
  0x39   : > { %1623 = sst [smem:[#allocation10 + $0x4]] (%p1946_p4), %s1857_s26  ;;  %s274_s21 = scalar_lea.sflag [#allocation4], %s273_s10 }
  0x3a   : > { %s1450_s9 = sshll.u32 %s292_s8, 26  ;;  %1624 = sst [smem:[#allocation10 + $0x5]] (%p1946_p4), %s1858_s13 }
  0x3b   : > { %s1451_s19 = sadd.s32 134217728, %s1450_s9  ;;  %s1859_s22 = smov 131072  }
  0x3c   : > { %1625 = dma.general (%p1946_p4), %s287_s20, 1024, %s301_s30, %s274_s21, %s1859_s22, [#allocation10], %s1451_s19, 0  }
  0x3d PF: > { %325 = sbr.rel (%p1975_p0) target bundleno = 866 (0x362), region = 48  ;;  %s2013_s5 = sand.u32 (!%p1975_p0), 1, %s1829_s25  }
  0x3e   : > { %s1453_s26 = sshll.u32 (!%p1975_p0), %s2013_s5, 6  ;;  %s328_s28 = scalar_lea.sflag (!%p1975_p0), [#allocation4], %s2013_s5 }
  0x3f   : > { %s2017_s16 = scalar_lea.vmem (!%p1975_p0), [#allocation3], %s1453_s26  ;;  %p2247_p8 = scmp.ne.s32.totalorder (!%p1975_p0), %s2241_s14, 0 }
  0x42   : > { %1812 = dma.done.wait (%p2247_p8), %s328_s28, 1024  }
  0x43   : > { %1814 = vsyncadd (%p2247_p8), %s328_s28, 4294966272 }
  0x44   : > { %1816 = dma.done.wait (%p1950_p5), [#allocation7], 8192  }
  0x45   : > { %1818 = vsyncadd (%p1950_p5), [#allocation7], 4294959104  ;;  %s1455_s11 = sshll.u32 %s2013_s5, 3  ;;  %v1860_v0 = vmov -inf   ;;  %v1711_v1 = vld [vmem:[%s2223_s1 + $0x38] sm:$0xff]   ;;  %v1712_v2 = vld [vmem:[%s2223_s1 + $0x30] sm:$0xff]  }
  0x46   : > { %374 = vst [vmem:[#allocation2] sm:$0xff] %v1860_v0  ;;  %375 = vst [vmem:[#allocation2 + $0x8] sm:$0xff] %v1860_v0  ;;  %1544 = vmatprep.subr.bf16.mxu0 %v1711_v1  ;;  %v1713_v3 = vld [vmem:[%s2223_s1 + $0x28] sm:$0xff]   ;;  %v1714_v4 = vld [vmem:[%s2223_s1 + $0x20] sm:$0xff]   ;;  %vm671_vm0 = vcmask 523264   ;;  %s2104_s22 = scalar_lea.vmem [#allocation8], %s1455_s11 }
  0x47   : > { %1545 = vmatpush3.bf16.msra.mxu0 %v1711_v1  ;;  %v1719_v5 = vld [vmem:[%s2017_s16] sm:$0xff]   ;;  %v1715_v6 = vld [vmem:[%s2223_s1 + $0x18] sm:$0xff]   ;;  %v1717_v9 = vld [vmem:[%s2223_s1 + $0x8] sm:$0xff]   ;;  %s2106_s26 = smov 0  }
  0x48   : > { %1546 = vmatprep.subr.bf16.mxu0 %v1712_v2  ;;  %1560 = vmatprep.mubr.bf16.mxu0 %v1719_v5  ;;  %v1716_v7 = vld [vmem:[%s2223_s1 + $0x10] sm:$0xff]   ;;  %v1727_v8 = vld [vmem:[%s2225_s3 + $0x18] sm:$0xff]   ;;  %v1718_v10 = vld [vmem:[%s2223_s1] sm:$0xff]  }
  0x49   : > { %1576 = vmatprep.subr.bf16.mxu1 %v1727_v8  ;;  %v1720_v11 = vld [vmem:[%s2017_s16 + $0x8] sm:$0xff]   ;;  %v1721_v12 = vld [vmem:[%s2017_s16 + $0x10] sm:$0xff]   ;;  %v1722_v13 = vld [vmem:[%s2017_s16 + $0x18] sm:$0xff]  }
  0x4a   : > { %1577 = vmatpush3.bf16.msra.mxu1 %v1727_v8  ;;  %v1723_v14 = vld [vmem:[%s2017_s16 + $0x20] sm:$0xff]   ;;  %v1724_v15 = vld [vmem:[%s2017_s16 + $0x28] sm:$0xff]   ;;  %v1725_v16 = vld [vmem:[%s2017_s16 + $0x30] sm:$0xff]  }
  0x4b   : > { %1547 = vmatpush3.bf16.msra.mxu0 %v1712_v2  ;;  %v1726_v17 = vld [vmem:[%s2017_s16 + $0x38] sm:$0xff]   ;;  %v1728_v18 = vld [vmem:[%s2225_s3 + $0x10] sm:$0xff]   ;;  %v1730_v20 = vld [vmem:[%s2225_s3] sm:$0xff]  }
  0x4c   : > { %1548 = vmatprep.subr.bf16.mxu0 %v1713_v3  ;;  %1578 = vmatprep.subr.bf16.mxu1 %v1728_v18  ;;  %v1729_v19 = vld [vmem:[%s2225_s3 + $0x8] sm:$0xff]   ;;  %v1456_v23 = vld [vmem:[%s2224_s2] ss:$0 sm:$0xff] }
  0x4e   : > { %1579 = vmatpush3.bf16.msra.mxu1 %v1728_v18 }
  0x4f   : > { %1549 = vmatpush3.bf16.msra.mxu0 %v1713_v3  ;;  %1580 = vmatprep.subr.bf16.mxu1 %v1729_v19 }
  0x50   : > { %1550 = vmatprep.subr.bf16.mxu0 %v1714_v4 }
  0x52   : > { %1581 = vmatpush3.bf16.msra.mxu1 %v1729_v19 }
  0x53   : > { %1551 = vmatpush3.bf16.msra.mxu0 %v1714_v4  ;;  %1582 = vmatprep.subr.bf16.mxu1 %v1730_v20 }
  0x54   : > { %1552 = vmatprep.subr.bf16.mxu0 %v1715_v6 }
  0x56   : > { %1583 = vmatpush3.bf16.msra.mxu1 %v1730_v20 }
  0x57   : > { %1553 = vmatpush3.bf16.msra.mxu0 %v1715_v6 }
  0x58   : > { %1554 = vmatprep.subr.bf16.mxu0 %v1716_v7 }
  0x5b   : > { %1555 = vmatpush3.bf16.msra.mxu0 %v1716_v7 }
  0x5c   : > { %1556 = vmatprep.subr.bf16.mxu0 %v1717_v9 }
  0x5f   : > { %1557 = vmatpush3.bf16.msra.mxu0 %v1717_v9 }
  0x60   : > { %1558 = vmatprep.subr.bf16.mxu0 %v1718_v10 }
  0x63   : > { %1559 = vmatpush3.bf16.msra.mxu0 %v1718_v10 }
  0x66   : > { %1561 = vmatmul.mubr.bf16.vlgmr.msra.gmra.mxu0 %v1720_v11 }
  0x67   : > { %1564 = vmatprep.mubr.bf16.mxu0 %v1721_v12 }
  0x6e   : > { %1565 = vmatmul.mubr.bf16.gmra.mxu0 %v1722_v13 }
  0x6f   : > { %1568 = vmatprep.mubr.bf16.mxu0 %v1723_v14 }
  0x76   : > { %1569 = vmatmul.mubr.bf16.gmra.mxu0 %v1724_v15  ;;  %v1473_v15 = vld [vmem:[%s2226_s4] ss:$0 sm:$0xff] }
  0x77   : > { %1572 = vmatprep.mubr.bf16.mxu0 %v1725_v16 }
  0x7e   : > { %1573 = vmatmul.mubr.bf16.gmra.mxu0 %v1726_v17 }
 0x126   : > { %v1562_v21 = vpop.f32.mrf.mxu0 }
 0x127   : > { %v554_v27 = vadd.f32 %v1562_v21, %v1456_v23 }
 0x128   : > { %v545_v22 = vpop.f32.mrf.mxu0 }
 0x129   : > { %v546_v25 = vadd.f32 %v1456_v23, %v545_v22  ;;  %v610_v34 = vmax.f32 %v554_v27, 0.0 }
 0x12a   : > { %v1563_v24 = vpop.f32.mrf.mxu0 }
 0x12b   : > { %v557_v26 = vadd.f32 %v1563_v24, %v1456_v23  ;;  %v608_v32 = vmax.f32 %v546_v25, 0.0 }
 0x12c   : > { %v548_v28 = vpop.f32.mrf.mxu0 }
 0x12d   : > { %v549_v29 = vadd.f32 %v1456_v23, %v548_v28  ;;  %v611_v30 = vmax.f32 %v557_v26, 0.0 }
 0x12e   : > { %v1566_v31 = vpop.f32.mrf.mxu0 }
 0x12f   : > { %v609_v33 = vmax.f32 %v549_v29, 0.0  ;;  %v625_v37 = vpack.c.bf16 %v611_v30, %v610_v34  ;;  %v570_v41 = vadd.f32 %v1566_v31, %v1456_v23 }
 0x130   : > { %v561_v35 = vpop.f32.mrf.mxu0 }
 0x131   : > { %v624_v36 = vpack.c.bf16 %v609_v33, %v608_v32  ;;  %v562_v39 = vadd.f32 %v1456_v23, %v561_v35  ;;  %v614_v48 = vmax.f32 %v570_v41, 0.0 }
 0x132   : > { %v1567_v38 = vpop.f32.mrf.mxu0 }
 0x133   : > { %v573_v40 = vadd.f32 %v1567_v38, %v1456_v23  ;;  %1584 = vmatprep.mubr.msk.bf16.mxu1 %vm671_vm0, %v624_v36  ;;  %v612_v46 = vmax.f32 %v562_v39, 0.0 }
 0x134   : > { %v564_v42 = vpop.f32.mrf.mxu0  ;;  %1585 = vmatmul.mubr.msk.bf16.vlgmr.msra.gmra.mxu1 %vm671_vm0, %v625_v37 }
 0x135   : > { %v565_v43 = vadd.f32 %v1456_v23, %v564_v42  ;;  %v615_v44 = vmax.f32 %v573_v40, 0.0 }
 0x136   : > { %v1570_v45 = vpop.f32.mrf.mxu0 }
 0x137   : > { %v613_v47 = vmax.f32 %v565_v43, 0.0  ;;  %v627_v51 = vpack.c.bf16 %v615_v44, %v614_v48  ;;  %v586_v55 = vadd.f32 %v1570_v45, %v1456_v23 }
 0x138   : > { %v577_v49 = vpop.f32.mrf.mxu0 }
 0x139   : > { %v626_v50 = vpack.c.bf16 %v613_v47, %v612_v46  ;;  %v578_v53 = vadd.f32 %v1456_v23, %v577_v49  ;;  %v618_v62 = vmax.f32 %v586_v55, 0.0 }
 0x13a   : > { %v1571_v52 = vpop.f32.mrf.mxu0 }
 0x13b   : > { %v589_v54 = vadd.f32 %v1571_v52, %v1456_v23  ;;  %1588 = vmatprep.mubr.msk.bf16.mxu1 %vm671_vm0, %v626_v50  ;;  %v616_v60 = vmax.f32 %v578_v53, 0.0 }
 0x13c   : > { %v580_v56 = vpop.f32.mrf.mxu0  ;;  %1589 = vmatmul.mubr.msk.bf16.gmra.mxu1 %vm671_vm0, %v627_v51 }
 0x13d   : > { %v581_v57 = vadd.f32 %v1456_v23, %v580_v56  ;;  %v619_v58 = vmax.f32 %v589_v54, 0.0 }
 0x13e   : > { %v1574_v59 = vpop.f32.mrf.mxu0 }
 0x13f   : > { %v617_v61 = vmax.f32 %v581_v57, 0.0  ;;  %v629_v1 = vpack.c.bf16 %v619_v58, %v618_v62  ;;  %v602_v5 = vadd.f32 %v1574_v59, %v1456_v23 }
 0x140   : > { %v593_v63 = vpop.f32.mrf.mxu0 }
 0x141   : > { %v628_v0 = vpack.c.bf16 %v617_v61, %v616_v60  ;;  %v594_v3 = vadd.f32 %v1456_v23, %v593_v63  ;;  %v622_v11 = vmax.f32 %v602_v5, 0.0 }
 0x142   : > { %v1575_v2 = vpop.f32.mrf.mxu0 }
 0x143   : > { %v605_v4 = vadd.f32 %v1575_v2, %v1456_v23  ;;  %1592 = vmatprep.mubr.msk.bf16.mxu1 %vm671_vm0, %v628_v0  ;;  %v620_v9 = vmax.f32 %v594_v3, 0.0 }
 0x144   : > { %v596_v6 = vpop.f32.mrf.mxu0  ;;  %1593 = vmatmul.mubr.msk.bf16.gmra.mxu1 %vm671_vm0, %v629_v1 }
 0x145   : > { %v597_v7 = vadd.f32 %v1456_v23, %v596_v6  ;;  %v623_v8 = vmax.f32 %v605_v4, 0.0 }
 0x147   : > { %v621_v10 = vmax.f32 %v597_v7, 0.0  ;;  %v631_v13 = vpack.c.bf16 %v623_v8, %v622_v11 }
 0x149   : > { %v630_v12 = vpack.c.bf16 %v621_v10, %v620_v9 }
 0x14b   : > { %1596 = vmatprep.mubr.msk.bf16.mxu1 %vm671_vm0, %v630_v12 }
 0x14c   : > { %1597 = vmatmul.mubr.msk.bf16.gmra.mxu1 %vm671_vm0, %v631_v13 }
 0x1f4   : > { %v1586_v14 = vpop.f32.mrf.mxu1 }
 0x1f5   : > { %v739_v17 = vadd.f32 %v1586_v14, %v1473_v15 }
 0x1f6   : > { %v730_v16 = vpop.f32.mrf.mxu1 }
 0x1f7   : > { %v731_v19 = vadd.f32 %v1473_v15, %v730_v16  ;;  %v795_v22 = vmax.f32 %v739_v17, 0.0 }
 0x1f8   : > { %v1587_v18 = vpop.f32.mrf.mxu1 }
 0x1f9   : > { %v742_v20 = vadd.f32 %v1587_v18, %v1473_v15  ;;  %v793_v26 = vmax.f32 %v731_v19, 0.0 }
 0x1fa   : > { %v733_v21 = vpop.f32.mrf.mxu1 }
 0x1fb   : > { %v796_v23 = vmax.f32 %v742_v20, 0.0  ;;  %v734_v24 = vadd.f32 %v1473_v15, %v733_v21 }
 0x1fc   : > { %v1590_v25 = vpop.f32.mrf.mxu1 }
 0x1fd   : > { %v2086_v27 = vpack.c.bf16 %v796_v23, %v795_v22  ;;  %v794_v28 = vmax.f32 %v734_v24, 0.0  ;;  %v755_v31 = vadd.f32 %v1590_v25, %v1473_v15 }
 0x1fe   : > { %v746_v29 = vpop.f32.mrf.mxu1 }
 0x1ff   : > { %v2088_v30 = vpack.c.bf16 %v794_v28, %v793_v26  ;;  %v747_v33 = vadd.f32 %v1473_v15, %v746_v29  ;;  %v799_v36 = vmax.f32 %v755_v31, 0.0 }
 0x200   : > { %v1591_v32 = vpop.f32.mrf.mxu1 }
 0x201   : > { %v758_v34 = vadd.f32 %v1591_v32, %v1473_v15  ;;  %v797_v40 = vmax.f32 %v747_v33, 0.0 }
 0x202   : > { %v749_v35 = vpop.f32.mrf.mxu1 }
 0x203   : > { %v800_v37 = vmax.f32 %v758_v34, 0.0  ;;  %v750_v38 = vadd.f32 %v1473_v15, %v749_v35 }
 0x204   : > { %v1594_v39 = vpop.f32.mrf.mxu1 }
 0x205   : > { %v2090_v41 = vpack.c.bf16 %v800_v37, %v799_v36  ;;  %v798_v42 = vmax.f32 %v750_v38, 0.0  ;;  %v771_v45 = vadd.f32 %v1594_v39, %v1473_v15 }
 0x206   : > { %v762_v43 = vpop.f32.mrf.mxu1 }
 0x207   : > { %v2092_v44 = vpack.c.bf16 %v798_v42, %v797_v40  ;;  %v763_v47 = vadd.f32 %v1473_v15, %v762_v43  ;;  %v803_v50 = vmax.f32 %v771_v45, 0.0 }
 0x208   : > { %v1595_v46 = vpop.f32.mrf.mxu1 }
 0x209   : > { %v774_v48 = vadd.f32 %v1595_v46, %v1473_v15  ;;  %v801_v54 = vmax.f32 %v763_v47, 0.0 }
 0x20a   : > { %v765_v49 = vpop.f32.mrf.mxu1 }
 0x20b   : > { %v804_v51 = vmax.f32 %v774_v48, 0.0  ;;  %v766_v52 = vadd.f32 %v1473_v15, %v765_v49 }
 0x20c   : > { %v1598_v53 = vpop.f32.mrf.mxu1 }
 0x20d   : > { %v2094_v55 = vpack.c.bf16 %v804_v51, %v803_v50  ;;  %v802_v56 = vmax.f32 %v766_v52, 0.0  ;;  %v787_v59 = vadd.f32 %v1598_v53, %v1473_v15 }
 0x20e   : > { %v778_v57 = vpop.f32.mrf.mxu1 }
 0x20f   : > { %v2096_v58 = vpack.c.bf16 %v802_v56, %v801_v54  ;;  %v779_v61 = vadd.f32 %v1473_v15, %v778_v57  ;;  %v807_v0 = vmax.f32 %v787_v59, 0.0 }
 0x210   : > { %v1599_v60 = vpop.f32.mrf.mxu1 }
 0x211   : > { %v790_v62 = vadd.f32 %v1599_v60, %v1473_v15  ;;  %v805_v3 = vmax.f32 %v779_v61, 0.0 }
 0x212   : > { %v781_v63 = vpop.f32.mrf.mxu1 }
 0x213   : > { %v808_v1 = vmax.f32 %v790_v62, 0.0  ;;  %v782_v2 = vadd.f32 %v1473_v15, %v781_v63 }
 0x215   : > { %v2098_v4 = vpack.c.bf16 %v808_v1, %v807_v0  ;;  %v806_v5 = vmax.f32 %v782_v2, 0.0 }
 0x217   : > { %v2100_v6 = vpack.c.bf16 %v806_v5, %v805_v3 }
 0x218 LB: >> { %v1861_v7 = vmov 0   ;;  %s1486_s28 = sshll.u32 %s1849_s26, 8  ;;  %vm1117_vm1 = vcmask 1041409   ;;  %vm1119_vm2 = vcmask 1043459   ;;  %vm1121_vm3 = vcmask 1045509   ;;  %s822_s26 = sadd.s32 1, %s1849_s26   ;;  %s1849_s26 = sphi %s2106_s26, %s822_s26  }
 0x219   : >> { %956 = vmatprep.mubr.bf16.mxu0 %v1861_v7  ;;  %996 = vmatprep.mubr.bf16.mxu1 %v1861_v7  ;;  %s2114_s18 = sshra.s32 %s1486_s28, 7  ;;  %vm1123_vm4 = vcmask 1047559   ;;  %p819_p4 = scmp.ge.s32.totalorder %s822_s26, 4  }
 0x21a   : >> { %s1487_s10 = sshll.u32 %s2114_s18, 2  ;;  %s1504_s20 = sshll.u32 %s2114_s18, 1 }
 0x21b   : >> { %s2117_s11 = scalar_lea.vmem [#allocation6], %s1487_s10  ;;  %s1090_s23 = scalar_lea.vmem [#allocation2], %s1504_s20 }
 0x21c   : >> { %v842_v8 = vld [vmem:[%s2117_s11 + $0x1c0] sm:$0xff]  ;;  %s1515_s30 = sshll.u32 (%p819_p4), %s1837_s27, 7  ;;  %s1335_s8 = sshll.u32 (%p819_p4), %s2104_s22, 4  ;;  %s1336_s8 = int_to_ptr.vmem [resolvable:$true] %s1335_s8 }
 0x21d   : >> { %v843_v9 = vld [vmem:[%s2117_s11 + $0x1e0] sm:$0xff]  ;;  %s1333_s13 = scalar_lea.hbm (%p819_p4), %s2229_s7, %s1515_s30  ;;  %s1319_s19 = scalar_lea.sflag (%p819_p4), [#allocation5], %s2013_s5 }
 0x21e   : >> { %v840_v10 = vld [vmem:[%s2117_s11 + $0x180] sm:$0xff]  ;;  %v1503_v11 = vcombine.high %v842_v8, %v843_v9  ;;  %v1502_v12 = vcombine.low %v842_v8, %v843_v9  ;;  %s1757_s21 = scalar_lea.vmem (%p819_p4), %s1336_s8, 128  ;;  %p2248_p9 = scmp.ne.s32.totalorder (%p819_p4), %s2242_s15, 0 }
 0x21f   : >> { %v841_v13 = vld [vmem:[%s2117_s11 + $0x1a0] sm:$0xff]  ;;  %p1758_p5 = scmp.ne.s32.totalorder (%p819_p4), %s1336_s8, %s1757_s21  ;;  %s1864_s26 = smov (%p819_p4), [#allocation8]  }
 0x220   : >> { %v1501_v14 = vcombine.high %v840_v10, %v841_v13  ;;  %v838_v15 = vld [vmem:[%s2117_s11 + $0x140] sm:$0xff]  ;;  %924 = vmatprep.subr.bf16.mxu0 %v1503_v11  ;;  %1600 = vmatprep.subr.bf16.mxu1 %v1503_v11  ;;  %v1500_v17 = vcombine.low %v840_v10, %v841_v13  ;;  %s1761_s28 = sshll.u32 (%p819_p4), %s1864_s26, 4  ;;  %s1762_s28 = int_to_ptr.vmem [resolvable:$false] %s1761_s28 }
 0x221   : >> { %v839_v16 = vld [vmem:[%s2117_s11 + $0x160] sm:$0xff]  ;;  %925 = vmatpush1.bf16.msra.mxu0 %v1502_v12  ;;  %1608 = vmatpush1.bf16.msra.mxu1 %v1502_v12  ;;  %p1759_p11 = pnand (%p819_p4), %p1758_p5, %p2248_p9  ;;  %s1763_s18 = scalar_lea.vmem (%p819_p4), %s1762_s28, 256 }
 0x222   : >> { %926 = vmatprep.subr.bf16.mxu0 %v1501_v14  ;;  %1601 = vmatprep.subr.bf16.mxu1 %v1501_v14  ;;  %v1499_v18 = vcombine.high %v838_v15, %v839_v16  ;;  %v836_v19 = vld [vmem:[%s2117_s11 + $0x100] sm:$0xff]  ;;  %v1498_v21 = vcombine.low %v838_v15, %v839_v16  ;;  %p1764_p1 = scmp.lt.s32.totalorder (%p819_p4), %s1336_s8, %s1762_s28  ;;  %p1765_p2 = scmp.lt.s32.totalorder (%p819_p4), %s1763_s18, %s1757_s21 }
 0x223   : >> { %v837_v20 = vld [vmem:[%s2117_s11 + $0x120] sm:$0xff]  ;;  %p1760_p0 = pneg (%p819_p4), %p1759_p11 }
 0x224   : >> { %v1497_v22 = vcombine.high %v836_v19, %v837_v20  ;;  %v834_v23 = vld [vmem:[%s2117_s11 + $0xc0] sm:$0xff]  ;;  %v1496_v25 = vcombine.low %v836_v19, %v837_v20  ;;  %p1766_p6 = por (%p819_p4), %p1765_p2, %p1764_p1 }
 0x225   : >> { %927 = vmatpush1.bf16.msra.mxu0 %v1500_v17  ;;  %1609 = vmatpush1.bf16.msra.mxu1 %v1500_v17  ;;  %v835_v24 = vld [vmem:[%s2117_s11 + $0xe0] sm:$0xff] }
 0x226   : >> { %928 = vmatprep.subr.bf16.mxu0 %v1499_v18  ;;  %1602 = vmatprep.subr.bf16.mxu1 %v1499_v18  ;;  %v1495_v26 = vcombine.high %v834_v23, %v835_v24  ;;  %v832_v28 = vld [vmem:[%s2117_s11 + $0x80] sm:$0xff]  ;;  %v1494_v31 = vcombine.low %v834_v23, %v835_v24  ;;  %p1767_p3 = pnand (%p819_p4), %p1766_p6, %p1760_p0 }
 0x227   : >> { %v833_v29 = vld [vmem:[%s2117_s11 + $0xa0] sm:$0xff] }
 0x228   : >> { %v1493_v32 = vcombine.high %v832_v28, %v833_v29  ;;  %v830_v33 = vld [vmem:[%s2117_s11 + $0x40] sm:$0xff]  ;;  %v1492_v35 = vcombine.low %v832_v28, %v833_v29 }
 0x229   : >> { %929 = vmatpush1.bf16.msra.mxu0 %v1498_v21  ;;  %1610 = vmatpush1.bf16.msra.mxu1 %v1498_v21  ;;  %v831_v34 = vld [vmem:[%s2117_s11 + $0x60] sm:$0xff] }
 0x22a   : >> { %930 = vmatprep.subr.bf16.mxu0 %v1497_v22  ;;  %1603 = vmatprep.subr.bf16.mxu1 %v1497_v22  ;;  %v1491_v36 = vcombine.high %v830_v33, %v831_v34  ;;  %v828_v37 = vld [vmem:[%s2117_s11] sm:$0xff]  ;;  %v1490_v39 = vcombine.low %v830_v33, %v831_v34 }
 0x22b   : >> { %v829_v38 = vld [vmem:[%s2117_s11 + $0x20] sm:$0xff] }
 0x22c   : >> { %v1489_v40 = vcombine.high %v828_v37, %v829_v38  ;;  %v1488_v42 = vcombine.low %v828_v37, %v829_v38 }
 0x22d   : >> { %931 = vmatpush1.bf16.msra.mxu0 %v1496_v25  ;;  %1611 = vmatpush1.bf16.msra.mxu1 %v1496_v25 }
 0x22e   : >> { %932 = vmatprep.subr.bf16.mxu0 %v1495_v26  ;;  %1604 = vmatprep.subr.bf16.mxu1 %v1495_v26 }
 0x231   : >> { %933 = vmatpush1.bf16.msra.mxu0 %v1494_v31  ;;  %1612 = vmatpush1.bf16.msra.mxu1 %v1494_v31 }
 0x232   : >> { %934 = vmatprep.subr.bf16.mxu0 %v1493_v32  ;;  %1605 = vmatprep.subr.bf16.mxu1 %v1493_v32 }
 0x235   : >> { %935 = vmatpush1.bf16.msra.mxu0 %v1492_v35  ;;  %1613 = vmatpush1.bf16.msra.mxu1 %v1492_v35 }
 0x236   : >> { %936 = vmatprep.subr.bf16.mxu0 %v1491_v36  ;;  %1606 = vmatprep.subr.bf16.mxu1 %v1491_v36 }
 0x239   : >> { %937 = vmatpush1.bf16.msra.mxu0 %v1490_v39  ;;  %1614 = vmatpush1.bf16.msra.mxu1 %v1490_v39 }
 0x23a   : >> { %938 = vmatprep.subr.bf16.mxu0 %v1489_v40  ;;  %1607 = vmatprep.subr.bf16.mxu1 %v1489_v40 }
 0x23d   : >> { %939 = vmatpush1.bf16.msra.mxu0 %v1488_v42  ;;  %1615 = vmatpush1.bf16.msra.mxu1 %v1488_v42 }
 0x240   : >> { %957 = vmatmul.mubr.bf16.vlgmr.msra.gmra.mxu0 %v2088_v30  ;;  %997 = vmatmul.mubr.bf16.vlgmr.msra.gmra.mxu1 %v2096_v58 }
 0x241   : >> { %966 = vmatprep.mubr.bf16.mxu0 %v1861_v7  ;;  %1006 = vmatprep.mubr.bf16.mxu1 %v1861_v7 }
 0x248   : >> { %967 = vmatmul.mubr.bf16.gmra.mxu0 %v2086_v27  ;;  %1007 = vmatmul.mubr.bf16.gmra.mxu1 %v2094_v55 }
 0x249   : >> { %976 = vmatprep.mubr.bf16.mxu0 %v1861_v7  ;;  %1016 = vmatprep.mubr.bf16.mxu1 %v1861_v7 }
 0x250   : >> { %977 = vmatmul.mubr.bf16.gmra.mxu0 %v2092_v44  ;;  %1017 = vmatmul.mubr.bf16.gmra.mxu1 %v2100_v6 }
 0x251   : >> { %986 = vmatprep.mubr.bf16.mxu0 %v1861_v7  ;;  %1026 = vmatprep.mubr.bf16.mxu1 %v1861_v7 }
 0x258   : >> { %987 = vmatmul.mubr.bf16.gmra.mxu0 %v2090_v41  ;;  %1027 = vmatmul.mubr.bf16.gmra.mxu1 %v2098_v4 }
 0x300   : >> { %v958_v43 = vpop.f32.mrf.mxu0  ;;  %v998_v45 = vpop.f32.mrf.mxu1 }
 0x302   : >> { %v960_v46 = vpop.f32.mrf.mxu0  ;;  %v1000_v47 = vpop.f32.mrf.mxu1 }
 0x304   : >> { %v962_v48 = vpop.f32.mrf.mxu0  ;;  %v1002_v49 = vpop.f32.mrf.mxu1 }
 0x305   : >> { %v1037_v0 = vmax.f32 %v958_v43, %v962_v48  ;;  %v1063_v1 = vmax.f32 %v998_v45, %v1002_v49 }
 0x306   : >> { %v964_v50 = vpop.f32.mrf.mxu0  ;;  %v1004_v51 = vpop.f32.mrf.mxu1 }
 0x307   : >> { %v1050_v5 = vmax.f32 %v960_v46, %v964_v50  ;;  %v1076_v7 = vmax.f32 %v1000_v47, %v1004_v51 }
 0x308   : >> { %v968_v52 = vpop.f32.mrf.mxu0  ;;  %v1008_v53 = vpop.f32.mrf.mxu1 }
 0x309   : >> { %v1038_v8 = vmax.f32 %v1037_v0, %v968_v52  ;;  %v1064_v9 = vmax.f32 %v1063_v1, %v1008_v53 }
 0x30a   : >> { %v970_v54 = vpop.f32.mrf.mxu0  ;;  %v1010_v56 = vpop.f32.mrf.mxu1 }
 0x30b   : >> { %v1051_v12 = vmax.f32 %v1050_v5, %v970_v54  ;;  %v1077_v13 = vmax.f32 %v1076_v7, %v1010_v56  ;;  %v1862_v54 = vmov 1983009808  }
 0x30c   : >> { %v972_v57 = vpop.f32.mrf.mxu0  ;;  %v1012_v59 = vpop.f32.mrf.mxu1  ;;  %v1098_v56 = vunpack.c.l.s4 %v1862_v54 }
 0x30d   : >> { %v1039_v14 = vmax.f32 %v1038_v8, %v972_v57  ;;  %v1065_v15 = vmax.f32 %v1064_v9, %v1012_v59  ;;  %v1100_v57 = vlaneseq }
 0x30e   : >> { %v974_v60 = vpop.f32.mrf.mxu0  ;;  %v1014_v61 = vpop.f32.mrf.mxu1 }
 0x30f   : >> { %v1052_v18 = vmax.f32 %v1051_v12, %v974_v60  ;;  %v1078_v19 = vmax.f32 %v1077_v13, %v1014_v61  ;;  %v2149_v5 = vshrl.u32 %v1100_v57, 7 }
 0x310   : >> { %v978_v62 = vpop.f32.mrf.mxu0  ;;  %v1018_v63 = vpop.f32.mrf.mxu1 }
 0x311   : >> { %v1040_v20 = vmax.f32 %v1039_v14, %v978_v62  ;;  %v1066_v21 = vmax.f32 %v1065_v15, %v1018_v63  ;;  %v1165_v30 = vsub.s32 (%p819_p4), 7, %v2149_v5 }
 0x312   : >> { %v980_v2 = vpop.f32.mrf.mxu0  ;;  %v1020_v3 = vpop.f32.mrf.mxu1 }
 0x313   : >> { %v1053_v24 = vmax.f32 %v1052_v18, %v980_v2  ;;  %v1079_v25 = vmax.f32 %v1078_v19, %v1020_v3  ;;  %v1099_v3 = vunpack.c.0.s8 %v1098_v56 }
 0x314   : >> { %v982_v10 = vpop.f32.mrf.mxu0  ;;  %v1022_v11 = vpop.f32.mrf.mxu1 }
 0x315   : >> { %v1041_v26 = vmax.f32 %v1040_v20, %v982_v10  ;;  %v1067_v28 = vmax.f32 %v1066_v21, %v1022_v11  ;;  %v2152_v13 = vsub.s32 %v1099_v3, %v2149_v5 }
 0x316   : >> { %v984_v16 = vpop.f32.mrf.mxu0  ;;  %v1024_v17 = vpop.f32.mrf.mxu1 }
 0x317   : >> { %v1054_v32 = vmax.f32 %v1053_v24, %v984_v16  ;;  %v1080_v33 = vmax.f32 %v1079_v25, %v1024_v17  ;;  %v1091_v24 = vld [vmem:[%s1090_s23] sm:$0xf] }
 0x318   : >> { %v988_v22 = vpop.f32.mrf.mxu0  ;;  %v1028_v23 = vpop.f32.mrf.mxu1 }
 0x319   : >> { %v1042_v34 = vmax.f32 %v1041_v26, %v988_v22  ;;  %v1068_v35 = vmax.f32 %v1067_v28, %v1028_v23 }
 0x31a   : >> { %v990_v29 = vpop.f32.mrf.mxu0  ;;  %v1030_v31 = vpop.f32.mrf.mxu1 }
 0x31b   : >> { %v1055_v38 = vmax.f32 %v1054_v32, %v990_v29  ;;  %v1081_v39 = vmax.f32 %v1080_v33, %v1030_v31  ;;  %v1133_v31 = vld [vmem:[%s2228_s6] sm:$0xff] (%p819_p4)  ;;  %v1137_v32 = vsub.s32 (%p819_p4), 0, %v2149_v5  ;;  %v1141_v33 = vsub.s32 (%p819_p4), 1, %v2149_v5 }
 0x31c   : >> { %v992_v36 = vpop.f32.mrf.mxu0  ;;  %v1032_v37 = vpop.f32.mrf.mxu1  ;;  %v1166_v4 = vrot.slane (%p819_p4), %v1133_v31, %v1165_v30 }
 0x31d   : >> { %v1043_v40 = vmax.f32 %v1042_v34, %v992_v36  ;;  %v1069_v42 = vmax.f32 %v1068_v35, %v1032_v37  ;;  %v1145_v34 = vsub.s32 (%p819_p4), 2, %v2149_v5  ;;  %v1149_v35 = vsub.s32 (%p819_p4), 3, %v2149_v5 }
 0x31e   : >> { %v994_v43 = vpop.f32.mrf.mxu0  ;;  %v1034_v45 = vpop.f32.mrf.mxu1  ;;  %v1153_v36 = vsub.s32 (%p819_p4), 4, %v2149_v5  ;;  %v1157_v37 = vsub.s32 (%p819_p4), 5, %v2149_v5 }
 0x31f   : >> { %v1044_v46 = vrot.slane %v1043_v40, 4  ;;  %v1070_v47 = vrot.slane %v1069_v42, 4  ;;  %v1056_v48 = vmax.f32 %v1055_v38, %v994_v43  ;;  %v1082_v49 = vmax.f32 %v1081_v39, %v1034_v45 }
 0x320   : > { %v1161_v38 = vsub.s32 (%p819_p4), 6, %v2149_v5  ;;  %v1138_v39 = vrot.slane (%p819_p4), %v1133_v31, %v1137_v32  ;;  %v1146_v27 = vrot.slane (%p819_p4), %v1133_v31, %v1145_v34  ;;  %v1150_v41 = vrot.slane (%p819_p4), %v1133_v31, %v1149_v35 }
 0x321   : >> { %v1045_v50 = vmax.f32 %v1043_v40, %v1044_v46  ;;  %v1071_v51 = vmax.f32 %v1069_v42, %v1070_v47  ;;  %v1057_v52 = vrot.slane %v1056_v48, 4  ;;  %v1083_v53 = vrot.slane %v1082_v49, 4 }
 0x322   : > { %v1142_v40 = vrot.slane (%p819_p4), %v1133_v31, %v1141_v33  ;;  %v1154_v44 = vrot.slane (%p819_p4), %v1133_v31, %v1153_v36  ;;  %v1158_v55 = vrot.slane (%p819_p4), %v1133_v31, %v1157_v37  ;;  %v1162_v58 = vrot.slane (%p819_p4), %v1133_v31, %v1161_v38 }
 0x323   : >> { %v1046_v59 = vrot.slane %v1045_v50, 2  ;;  %v1072_v60 = vrot.slane %v1071_v51, 2  ;;  %v1058_v61 = vmax.f32 %v1056_v48, %v1057_v52  ;;  %v1084_v62 = vmax.f32 %v1082_v49, %v1083_v53 }
 0x324   : > { %v1167_v6 = vcombine.low (%p819_p4), %v1138_v39, %v1142_v40  ;;  %v1168_v42 = vcombine.low (%p819_p4), %v1146_v27, %v1150_v41  ;;  %v1184_v43 = vcombine.low (%p819_p4), %v1154_v44, %v1158_v55  ;;  %v1185_v46 = vcombine.low (%p819_p4), %v1162_v58, %v1166_v4 }
 0x325   : >> { %v1047_v63 = vmax.f32 %v1045_v50, %v1046_v59  ;;  %v1073_v0 = vmax.f32 %v1071_v51, %v1072_v60  ;;  %v1059_v1 = vrot.slane %v1058_v61, 2  ;;  %v1085_v2 = vrot.slane %v1084_v62, 2 }
 0x326   : > { %v1175_v45 = vrot.slane (%p819_p4), %v1167_v6, %v2152_v13  ;;  %v1182_v47 = vrot.slane (%p819_p4), %v1168_v42, %v2152_v13  ;;  %v1192_v48 = vrot.slane (%p819_p4), %v1184_v43, %v2152_v13  ;;  %v1199_v50 = vrot.slane (%p819_p4), %v1185_v46, %v2152_v13 }
 0x327   : >> { %v1048_v7 = vrot.slane %v1047_v63, 1  ;;  %v1074_v8 = vrot.slane %v1073_v0, 1  ;;  %v1060_v9 = vmax.f32 %v1058_v61, %v1059_v1  ;;  %v1086_v10 = vmax.f32 %v1084_v62, %v1085_v2 }
 0x328   : > { %v1183_v52 = vcombine.low (%p819_p4), %v1175_v45, %v1182_v47  ;;  %v1863_v53 = vmov (%p819_p4), 1966171168   ;;  %v1200_v56 = vcombine.low (%p819_p4), %v1192_v48, %v1199_v50 }
 0x329   : >> { %v1061_v11 = vrot.slane %v1060_v9, 1  ;;  %v1087_v12 = vrot.slane %v1086_v10, 1  ;;  %v1049_v14 = vmax.f32 %v1047_v63, %v1048_v7  ;;  %v1075_v15 = vmax.f32 %v1073_v0, %v1074_v8 }
 0x32a   : > { %v1272_v54 = vunpack.c.l.s4 (%p819_p4), %v1863_v53 }
 0x32b   : >> { %v1062_v16 = vmax.f32 %v1060_v9, %v1061_v11  ;;  %v1088_v17 = vmax.f32 %v1086_v10, %v1087_v12 }
 0x32c   : > { %v1273_v61 = vunpack.c.0.s8 (%p819_p4), %v1272_v54 }
 0x32d   : >> { %v1096_v18 = vcombine.low %v1049_v14, %v1062_v16  ;;  %v1104_v19 = vcombine.low %v1075_v15, %v1088_v17 }
 0x32e   : > { %v1276_v8 = vsub.s32 (%p819_p4), %v1273_v61, %v2149_v5 }
 0x32f   : >> { %v1111_v20 = vrot.slane %v1104_v19, %v2152_v13  ;;  %v1103_v21 = vrot.slane %v1096_v18, %v2152_v13 }
 0x331   : >> { %v1116_v22 = vrot.slane %v1111_v20, 7 }
 0x333   : >> { %v1118_v23 = vsel %vm1117_vm1, %v1116_v22, %v1103_v21 }
 0x334   : >> { %v1120_v25 = vsel %vm1119_vm2, %v1116_v22, %v1118_v23 }
 0x335   : >> { %v1122_v26 = vsel %vm1121_vm3, %v1116_v22, %v1120_v25  ;;  %821 = sbr.rel (!%p819_p4) target bundleno = 536 (0x218), region = 119 }
 0x336   : >> { %v1124_v28 = vsel %vm1123_vm4, %v1116_v22, %v1122_v26 }
 0x337   : >> { %v1126_v29 = vmax.f32 %v1091_v24, %v1124_v28 }
 0x339   : >> { %1127 = vst [vmem:[%s1090_s23] sm:$0xf] %v1126_v29 }
 0x340   : > { %v1131_v49 = vld [vmem:[#allocation2] sm:$0xff]  ;;  %v1132_v51 = vld [vmem:[#allocation2 + $0x8] sm:$0xff] }
 0x341   : > { %v1203_v57 = vadd.f32 %v1183_v52, %v1131_v49  ;;  %v1204_v59 = vadd.f32 %v1200_v56, %v1132_v51 }
 0x343   : > { %v1205_v60 = vmax.f32 %v1203_v57, 0.0  ;;  %v1206_v62 = vmax.f32 %v1204_v59, 0.0 }
 0x345   : > { %v1209_v63 = vcombine.high %v1205_v60, %v1205_v60  ;;  %v1216_v0 = vrot.slane %v1205_v60, %v2152_v13  ;;  %v1226_v1 = vcombine.high %v1206_v62, %v1206_v62  ;;  %v1233_v2 = vrot.slane %v1206_v62, %v2152_v13 }
 0x347   : > { %v1223_v3 = vrot.slane %v1209_v63, %v2152_v13  ;;  %v1224_v7 = vcombine.high %v1216_v0, %v1216_v0  ;;  %v1240_v9 = vrot.slane %v1226_v1, %v2152_v13  ;;  %v1241_v10 = vcombine.high %v1233_v2, %v1233_v2 }
 0x349   : > { %v1225_v11 = vcombine.high %v1223_v3, %v1223_v3  ;;  %v1505_v12 = vpack.c.bf16 %v1224_v7, %v1216_v0  ;;  %v1242_v14 = vcombine.high %v1240_v9, %v1240_v9  ;;  %v1507_v15 = vpack.c.bf16 %v1241_v10, %v1233_v2 }
 0x34b   : > { %v1506_v16 = vpack.c.bf16 %v1225_v11, %v1223_v3  ;;  %v1277_v17 = vrot.slane %v1505_v12, %v1276_v8  ;;  %v1508_v18 = vpack.c.bf16 %v1242_v14, %v1240_v9  ;;  %v1291_v19 = vrot.slane %v1507_v15, %v1276_v8 }
 0x34d   : > { %v1284_v20 = vrot.slane %v1506_v16, %v1276_v8  ;;  %v1298_v21 = vrot.slane %v1508_v18, %v1276_v8 }
 0x34f   : > { %v1299_v22 = vcombine.low %v1277_v17, %v1284_v20  ;;  %v1300_v5 = vcombine.low %v1291_v19, %v1298_v21 }
 0x351   : > { %v1307_v23 = vrot.slane %v1299_v22, %v1276_v8  ;;  %v1314_v13 = vrot.slane %v1300_v5, %v1276_v8 }
 0x353   : > { %v1315_v24 = vcombine.low %v1307_v23, %v1314_v13 }
 0x355   : > { %1317 = vst [vmem:[%s2104_s22] sm:$0xff] %v1315_v24 }
 0x356   : > { %1770 = shalt.err (!%p1767_p3)
}
 0x357   : > { %s1771_s27 = scalar_lea.hbm %s1333_s13, 128  ;;  %s1775_s10 = scalar_lea.hbm %s2229_s7, 256 }
 0x358   : > { %p1772_p7 = scmp.ne.s32.totalorder %s1333_s13, %s1771_s27  ;;  %p1776_p8 = scmp.lt.s32.totalorder %s1333_s13, %s2229_s7 }
 0x359   : > { %p1777_p4 = scmp.lt.s32.totalorder %s1775_s10, %s1771_s27 }
 0x35a   : > { %p1773_p10 = pnand %p1772_p7, %p2248_p9 }
 0x35b   : > { %p1778_p5 = por %p1777_p4, %p1776_p8 }
 0x35c   : > { %p1774_p12 = pneg %p1773_p10 }
 0x35e   : > { %p1779_p11 = pnand %p1778_p5, %p1774_p12 }
 0x360   : > { %1782 = shalt.err (!%p1779_p11)
}
 0x361   : > { %1629 = dma.vmem_to_hbm [thread:$0]  (%p2248_p9), %s1336_s8, 128, %s1333_s13, %s1319_s19  }
 0x362 PF: > { %s1347_s23 = sand.u32 1, %s1825_s24   ;;  %p2249_p0 = scmp.ne.s32.totalorder %s2244_s17, 0 }
 0x363   : > { %s1348_s14 = scalar_lea.sflag [#allocation5], %s1347_s23 }
 0x364   : > { %p1636_p1 = pnand %p1446_p13, %p2249_p0 }
 0x366   : > { %p1637_p2 = pneg %p1636_p1 }
 0x368   : > { %1820 = dma.done.wait (%p1637_p2), %s1348_s14, 128  }
 0x369   : > { %1822 = vsyncadd (%p1637_p2), %s1348_s14, 4294967168  ;;  %s24_s29 = sadd.s32 1, %s1845_s29   ;;  %s2250_s12 = sld [smem:[#allocation15_spill]] }
 0x36a   : > { %p21_p6 = scmp.ge.s32.totalorder %s24_s29, 4   ;;  %s2251_s26 = sld [smem:[#allocation18_spill]] }
 0x36b   : > { %s2252_s27 = sld [smem:[#allocation16_spill]]  ;;  %s2254_s24 = smov %s1829_s25 }
 0x36c   : > { %s2253_s28 = sld [smem:[#allocation17_spill]]  ;;  %23 = sbr.rel (!%p21_p6) target bundleno = 9 (0x9), region = 130 }
 0x36f   : > { %s2255_s25 = smov %s2250_s12 }
 0x371   :  { %1353 = vsyncpa [#allocation4], 1 }
 0x372   :  { %1355 = vsyncpa [#allocation4 + $0x1], 1 }
 0x373   :  { %1356 = vsyncpa [#allocation7], 1 }
 0x374   :  { %1357 = vsyncpa [#allocation5], 1 }
 0x375   :  { %1359 = vsyncpa [#allocation5 + $0x1], 1 }

</bundles_post_ra>
